<compile_context>
chip_gen: v7x
topology: tpu7x:2x2x1
jax: 0.10.0
libtpu: 0.0.40
codegen_flags: <defaults>
</compile_context>

<pallas_src>
import jax
import jax.numpy as jnp
from jax import lax
from jax.experimental import pallas as pl
from jax.experimental.pallas import tpu as pltpu


def graphsage_layer_kernel(a_ref, x_ref, invdeg_ref, ewa_ref, y_ref, acc_ref):
    k = pl.program_id(1)

    @pl.when(k == 0)
    def _():
        acc_ref[...] = jnp.zeros_like(acc_ref)

    # int8 count-adjacency tile, upcast in-kernel (exact for small integers) to the
    # matmul dtype; MXU matmul with f32 accumulation into the resident scratch.
    a_tile = a_ref[...].astype(x_ref.dtype)
    acc_ref[...] += jnp.dot(a_tile, x_ref[...], preferred_element_type=jnp.float32)

    @pl.when(k == pl.num_programs(1) - 1)
    def _():
        # Deferred row scaling: mean = inv_deg * (counts @ x); ew_agg is already a mean.
        aggr = acc_ref[...] * invdeg_ref[...] + ewa_ref[...]          # [bn, D]
        # NOTE: the PyTorch update() computes self.w(cat([x, aggr_out])) and then
        # discards it (h = F.normalize(aggr_out)); the dead Linear is omitted entirely.
        # F.normalize(aggr, p=2, dim=1, eps=1e-12) followed by nn.ReLU(), all in f32.
        sumsq = jnp.sum(aggr * aggr, axis=1, keepdims=True)           # [bn, 1] (XLU)
        inv_norm = lax.rsqrt(jnp.maximum(sumsq, 1e-24))               # == 1/max(||.||,1e-12)
        y_ref[...] = jnp.maximum(aggr * inv_norm, 0.0).astype(y_ref.dtype)


def graphsage_layer_pallas(adj_i8, x, inv_deg, ew_agg, *, block_n, block_k, out_dtype):
    N, D = x.shape
    assert adj_i8.shape == (N, N)
    assert inv_deg.shape == (N, 1) and ew_agg.shape == (N, 1)
    assert N % block_n == 0 and N % block_k == 0

    x_item = jnp.dtype(x.dtype).itemsize
    out_item = jnp.dtype(out_dtype).itemsize

    # Double-buffered tile footprint; generous headroom, capped for v7x (64 MiB phys).
    footprint = (2 * block_n * block_k                  # int8 adjacency tiles
                 + 2 * block_k * D * x_item             # x source tiles
                 + block_n * D * 4                      # f32 accumulator scratch
                 + 2 * block_n * D * out_item           # output tiles
                 + 8 * block_n * 4)                     # inv_deg / ew_agg tiles
    vmem_limit = int(min(max(2 * footprint + (8 << 20), 32 << 20), 48 << 20))

    cost = pl.CostEstimate(
        flops=2 * N * N * D,
        transcendentals=N,
        bytes_accessed=N * N + N * D * x_item + N * D * out_item + 8 * N,
    )

    grid = (N // block_n, N // block_k)
    return pl.pallas_call(
        graphsage_layer_kernel,
        out_shape=jax.ShapeDtypeStruct((N, D), out_dtype),
        grid_spec=pltpu.PrefetchScalarGridSpec(
            num_scalar_prefetch=0,
            grid=grid,
            in_specs=[
                pl.BlockSpec((block_n, block_k), lambda i, k: (i, k)),  # count tile
                pl.BlockSpec((block_k, D), lambda i, k: (k, 0)),        # source features
                pl.BlockSpec((block_n, 1), lambda i, k: (i, 0)),        # 1/deg (epilogue)
                pl.BlockSpec((block_n, 1), lambda i, k: (i, 0)),        # mean edge bias
            ],
            out_specs=pl.BlockSpec((block_n, D), lambda i, k: (i, 0)),
            scratch_shapes=[pltpu.VMEM((block_n, D), jnp.float32)],
        ),
        compiler_params=pltpu.CompilerParams(
            dimension_semantics=("parallel", "arbitrary"),  # node tiles shard across TCs
            vmem_limit_bytes=vmem_limit,
        ),
        cost_estimate=cost,
    )(adj_i8, x, inv_deg, ew_agg)


def build_graph_operands(edge_index, edge_weights, num_nodes):
    """int8 count adjacency [N,N], inv_deg [N,1] f32, mean edge bias ew_agg [N,1] f32.

    inv_deg * (counts @ x) + ew_agg == scatter_mean(x[src] + edge_weights[:, 0:1], dst)
    exactly (up to f32 summation order): counts are exact integers in int8 and the
    1/deg scale is deferred to the f32 epilogue (no rounding of the mean weights)."""
    src, dst = edge_index[0], edge_index[1]
    ew_col = edge_weights[:, 0:1].astype(jnp.float32)                  # edge_attr[:, 0]
    deg = jnp.zeros((num_nodes,), jnp.float32).at[dst].add(1.0)
    inv_deg = (1.0 / jnp.maximum(deg, 1.0))[:, None]                   # [N, 1]
    counts = jnp.zeros((num_nodes, num_nodes), jnp.int32).at[dst, src].add(1)
    adj_i8 = counts.astype(jnp.int8)     # exact while edge multiplicity < 128
    ew_agg = jnp.zeros((num_nodes, 1), jnp.float32).at[dst].add(ew_col) * inv_deg
    # TODO(synk): for genuinely sparse / large graphs replace the dense [N,N] counts with
    # a dst-sorted CSR gather kernel (scalar-prefetched row offsets, E-tiled accumulate).
    return adj_i8, inv_deg, ew_agg


def _pick_tile(n, target, align):
    """Largest multiple of `align` that divides n and is <= max(target, align)."""
    assert n % align == 0, f"N={n} must be a multiple of {align}"
    t = max(align, (min(target, n) // align) * align)
    while n % t:
        t -= align
    return t


def graphsage_forward(x, edge_index, edge_weights, nr_layers, *,
                      block_n=256, block_k=512, compute_dtype=jnp.bfloat16):
    """nr_layers x (GraphSageLayer -> ReLU).  The per-layer nn.Linear(2*dim, dim) is
    dead code in the original update() and therefore needs no parameters here."""
    N, D = x.shape
    adj_i8, inv_deg, ew_agg = build_graph_operands(edge_index, edge_weights, N)
    bn = _pick_tile(N, block_n, 32)     # int8 sublane tiling wants multiples of 32
    bk = _pick_tile(N, block_k, 128)    # lane dim of A / sublane dim of x
    # TODO(synk): when the int8 adjacency fits VMEM entirely, fuse all layers into one
    # pallas_call with A held resident in scratch and x ping-ponged in VMEM, removing
    # (nr_layers - 1) full N^2 HBM re-reads of the dominant operand.
    h = x.astype(compute_dtype)
    for layer in range(nr_layers):
        last = layer == nr_layers - 1
        out_dtype = jnp.float32 if last else compute_dtype   # bf16 between layers, f32 out
        h = graphsage_layer_pallas(adj_i8, h, inv_deg, ew_agg,
                                   block_n=bn, block_k=bk, out_dtype=out_dtype)
    return h


def graphsage_reference(x, edge_index, edge_weights, nr_layers):
    """Pure-JAX f32 reference of the PyTorch forward for a numerical self-check."""
    src, dst = edge_index[0], edge_index[1]
    N = x.shape[0]
    for _ in range(nr_layers):
        msg = x[src] + edge_weights[:, 0:1]
        summed = jnp.zeros_like(x).at[dst].add(msg)
        deg = jnp.zeros((N,), jnp.float32).at[dst].add(1.0)
        aggr = summed / jnp.maximum(deg, 1.0)[:, None]
        norm = jnp.sqrt(jnp.sum(aggr * aggr, axis=1, keepdims=True))
        x = jnp.maximum(aggr / jnp.maximum(norm, 1e-12), 0.0)
    return x


if __name__ == "__main__":
    # GraphSage(dim=128, edges_dim=1, nr_layers=2) on a small random graph.
    N, D, E, NR_LAYERS = 256, 128, 512, 2

    key = jax.random.PRNGKey(0)
    k_x, k_ei, k_ew = jax.random.split(key, 3)
    x = jax.random.normal(k_x, (N, D), jnp.float32)
    edge_index = jax.random.randint(k_ei, (2, E), 0, N, dtype=jnp.int32)
    edge_weights = jax.random.normal(k_ew, (E, 1), jnp.float32)

    ref = graphsage_reference(x, edge_index, edge_weights, NR_LAYERS)

    # f32 feature path: int8 counts are exact and inv_deg is applied in f32, so this
    # matches the PyTorch f32 forward up to summation order.
    out_f32 = jax.block_until_ready(
        graphsage_forward(x, edge_index, edge_weights, NR_LAYERS,
                          compute_dtype=jnp.float32))
    err_f32 = float(jnp.max(jnp.abs(out_f32 - ref)))
    assert out_f32.shape == (N, D) and out_f32.dtype == jnp.float32
    assert jnp.allclose(out_f32, ref, atol=1e-4, rtol=1e-4), f"f32 max_err={err_f32}"

    # bf16 feature path (default): only x is rounded; adjacency counts and the 1/deg
    # scale remain exact, so error is purely from bf16 feature rounding.
    out_bf16 = jax.block_until_ready(
        graphsage_forward(x, edge_index, edge_weights, NR_LAYERS,
                          compute_dtype=jnp.bfloat16))
    err_bf16 = float(jnp.max(jnp.abs(out_bf16 - ref)))
    assert jnp.allclose(out_bf16, ref, atol=2e-2, rtol=2e-2), f"bf16 max_err={err_bf16}"

    print("KERNEL_OK")
</pallas_src>

<mosaic_0001>
module attributes {stable_mosaic.version = 11 : i64} {
  func.func @graphsage_layer_kernel(%arg0: i32, %arg1: i32, %arg2: memref<256x256xi8, #tpu.memory_space<vmem>>, %arg3: memref<256x128xf32, #tpu.memory_space<vmem>>, %arg4: memref<256x1xf32, #tpu.memory_space<vmem>>, %arg5: memref<256x1xf32, #tpu.memory_space<vmem>>, %arg6: memref<256x128xf32, #tpu.memory_space<vmem>>, %arg7: memref<256x128xf32, #tpu.memory_space<vmem>>) attributes {dimension_semantics = [#tpu.dimension_semantics<parallel>, #tpu.dimension_semantics<arbitrary>], iteration_bounds = array<i64: 1, 1>, scalar_prefetch = 0 : i64, scratch_operands = 1 : i64, tpu.core_type = #tpu.core_type<tc>, window_params = [{transform_indices = @transform_0, window_bounds = array<i64: 256, 256>}, {transform_indices = @transform_1, window_bounds = array<i64: 256, 128>}, {transform_indices = @transform_2, window_bounds = array<i64: 256, 1>}, {transform_indices = @transform_3, window_bounds = array<i64: 256, 1>}, {transform_indices = @transform_4, window_bounds = array<i64: 256, 128>}]} {
    %c0_i32 = arith.constant 0 : i32
    %0 = arith.cmpi eq, %arg1, %c0_i32 : i32
    %1 = arith.extui %0 : i1 to i32
    %c0_i32_0 = arith.constant 0 : i32
    %2 = arith.cmpi ne, %1, %c0_i32_0 : i32
    scf.if %2 {
      %cst_10 = arith.constant 0.000000e+00 : f32
      %13 = vector.broadcast %cst_10 : f32 to vector<256x128xf32>
      %c0_11 = arith.constant 0 : index
      %c0_12 = arith.constant 0 : index
      %14 = vector.load %arg7[%c0_11, %c0_12] : memref<256x128xf32, #tpu.memory_space<vmem>>, vector<256x128xf32>
      tpu.vector_store %arg7[%c0_11, %c0_12], %13 {strides = array<i32>} : memref<256x128xf32, #tpu.memory_space<vmem>>, vector<256x128xf32>,
    } else {
    }
    %c0 = arith.constant 0 : index
    %c0_1 = arith.constant 0 : index
    %3 = vector.load %arg2[%c0, %c0_1] : memref<256x256xi8, #tpu.memory_space<vmem>>, vector<256x256xi8>
    %4 = arith.sitofp %3 : vector<256x256xi8> to vector<256x256xf32>
    %c0_2 = arith.constant 0 : index
    %c0_3 = arith.constant 0 : index
    %5 = vector.load %arg7[%c0_2, %c0_3] : memref<256x128xf32, #tpu.memory_space<vmem>>, vector<256x128xf32>
    %c0_4 = arith.constant 0 : index
    %c0_5 = arith.constant 0 : index
    %6 = vector.load %arg3[%c0_4, %c0_5] : memref<256x128xf32, #tpu.memory_space<vmem>>, vector<256x128xf32>
    %cst = arith.constant dense<0.000000e+00> : vector<256x128xf32>
    %7 = tpu.matmul %4, %6, %cst {dimension_numbers = #tpu.dot_dimension_numbers<[1], [0], [0], [1], [0, 0, 1, 1], [], []>} : vector<256x256xf32>, vector<256x128xf32>, vector<256x128xf32> -> vector<256x128xf32>
    %8 = arith.addf %5, %7 : vector<256x128xf32>
    %c0_6 = arith.constant 0 : index
    %c0_7 = arith.constant 0 : index
    %9 = vector.load %arg7[%c0_6, %c0_7] : memref<256x128xf32, #tpu.memory_space<vmem>>, vector<256x128xf32>
    tpu.vector_store %arg7[%c0_6, %c0_7], %8 {strides = array<i32>} : memref<256x128xf32, #tpu.memory_space<vmem>>, vector<256x128xf32>,
    %c0_i32_8 = arith.constant 0 : i32
    %10 = arith.cmpi eq, %arg1, %c0_i32_8 : i32
    %11 = arith.extui %10 : i1 to i32
    %c0_i32_9 = arith.constant 0 : i32
    %12 = arith.cmpi ne, %11, %c0_i32_9 : i32
    scf.if %12 {
      %c0_10 = arith.constant 0 : index
      %c0_11 = arith.constant 0 : index
      %13 = vector.load %arg7[%c0_10, %c0_11] : memref<256x128xf32, #tpu.memory_space<vmem>>, vector<256x128xf32>
      %c0_12 = arith.constant 0 : index
      %c0_13 = arith.constant 0 : index
      %14 = vector.load %arg4[%c0_12, %c0_13] : memref<256x1xf32, #tpu.memory_space<vmem>>, vector<256x1xf32>
      %15 = vector.broadcast %14 : vector<256x1xf32> to vector<256x128xf32>
      %16 = arith.mulf %13, %15 : vector<256x128xf32>
      %c0_14 = arith.constant 0 : index
      %c0_15 = arith.constant 0 : index
      %17 = vector.load %arg5[%c0_14, %c0_15] : memref<256x1xf32, #tpu.memory_space<vmem>>, vector<256x1xf32>
      %18 = vector.broadcast %17 : vector<256x1xf32> to vector<256x128xf32>
      %19 = arith.addf %16, %18 : vector<256x128xf32>
      %20 = arith.mulf %19, %19 : vector<256x128xf32>
      %cst_16 = arith.constant dense<0.000000e+00> : vector<256xf32>
      %21 = vector.multi_reduction <add>, %20, %cst_16 [1] : vector<256x128xf32> to vector<256xf32>
      %22 = vector.shape_cast %21 : vector<256xf32> to vector<256x1xf32>
      %cst_17 = arith.constant 1.000000e-24 : f32
      %23 = vector.broadcast %cst_17 : f32 to vector<256x1xf32>
      %24 = arith.maximumf %22, %23 : vector<256x1xf32>
      %25 = math.rsqrt %24 : vector<256x1xf32>
      %26 = vector.broadcast %25 : vector<256x1xf32> to vector<256x128xf32>
      %27 = arith.mulf %19, %26 : vector<256x128xf32>
      %cst_18 = arith.constant 0.000000e+00 : f32
      %28 = vector.broadcast %cst_18 : f32 to vector<256x128xf32>
      %29 = arith.maximumf %27, %28 : vector<256x128xf32>
      %c0_19 = arith.constant 0 : index
      %c0_20 = arith.constant 0 : index
      %30 = vector.load %arg6[%c0_19, %c0_20] : memref<256x128xf32, #tpu.memory_space<vmem>>, vector<256x128xf32>
      tpu.vector_store %arg6[%c0_19, %c0_20], %29 {strides = array<i32>} : memref<256x128xf32, #tpu.memory_space<vmem>>, vector<256x128xf32>,
    } else {
    }
    return
  }
  func.func @transform_0(%arg0: i32, %arg1: i32) -> (i32, i32) {
    %c0_i32 = arith.constant 0 : i32
    return %arg0, %arg1 : i32, i32
  }
  func.func @transform_1(%arg0: i32, %arg1: i32) -> (i32, i32) {
    %c0_i32 = arith.constant 0 : i32
    %c0_i32_0 = arith.constant 0 : i32
    return %arg1, %c0_i32 : i32, i32
  }
  func.func @transform_2(%arg0: i32, %arg1: i32) -> (i32, i32) {
    %c0_i32 = arith.constant 0 : i32
    %c0_i32_0 = arith.constant 0 : i32
    return %arg0, %c0_i32 : i32, i32
  }
  func.func @transform_3(%arg0: i32, %arg1: i32) -> (i32, i32) {
    %c0_i32 = arith.constant 0 : i32
    %c0_i32_0 = arith.constant 0 : i32
    return %arg0, %c0_i32 : i32, i32
  }
  func.func @transform_4(%arg0: i32, %arg1: i32) -> (i32, i32) {
    %c0_i32 = arith.constant 0 : i32
    %c0_i32_0 = arith.constant 0 : i32
    return %arg0, %c0_i32 : i32, i32
  }
}

</mosaic_0001>

<bundles_post_ra>
// kernel: tpu_custom_call.1
= control target key start
LH: loop header
LB: loop body
LE: loop exit
PB: predicated region body
PF: predicated region fallthrough
CT: control target
= control target key end

     0   :  { %v1481_v3 = vmov 0   ;;  %v1482_v8 = vmov 0.0|0.0   ;;  %s2264_s0 = inlined_call_operand.vmem [shape: s8[256,256], index: 0, kind: input, shape index: {}]   ;;  %s2265_s1 = inlined_call_operand.vmem [shape: f32[256,128], index: 1, kind: input, shape index: {}]   ;;  %s2266_s2 = inlined_call_operand.vmem [shape: f32[256,1], index: 2, kind: input, shape index: {}]   ;;  %s2267_s3 = inlined_call_operand.vmem [shape: f32[256,1], index: 3, kind: input, shape index: {}]   ;;  %s2268_s4 = inlined_call_operand.hbm [shape: f32[256,128], index: 4, kind: output, shape index: {}]  }
   0x1   :  { %v588_v0 = vld [vmem:[%s2266_s2 + $0x10] sm:$0xff]  ;;  %v586_v1 = vld [vmem:[%s2266_s2] sm:$0xff]  ;;  %1392 = vset.pattern.permute.xlu1 %v1481_v3  ;;  %1391 = vset.pattern.permute.xlu0 %v1481_v3  ;;  %v231_v4 = vld [vmem:[%s2265_s1 + $0x8] sm:$0xff] }
   0x2   :  { %v230_v2 = vld [vmem:[%s2265_s1] sm:$0xff]  ;;  %630 = vperm.xlu1 %1392, %v588_v0   ;;  %620 = vperm.xlu0 %1391, %v586_v1   ;;  %v232_v6 = vld [vmem:[%s2265_s1 + $0x10] sm:$0xff]  ;;  %v233_v7 = vld [vmem:[%s2265_s1 + $0x18] sm:$0xff] }
   0x3   :  { %v1307_v5 = vpack.c.bf16 %v231_v4, %v230_v2  ;;  %1306 = vmatprep.subr.bf16.mxu0 %v1482_v8  ;;  %1354 = vmatprep.subr.bf16.mxu1 %v1482_v8  ;;  %v589_v9 = vld [vmem:[%s2266_s2 + $0x18] sm:$0xff]  ;;  %v587_v10 = vld [vmem:[%s2266_s2 + $0x8] sm:$0xff]  ;;  %v1310_v11 = vpack.c.bf16 %v233_v7, %v232_v6  ;;  %v234_v12 = vld [vmem:[%s2265_s1 + $0x20] sm:$0xff] }
   0x4   :  { %v235_v13 = vld [vmem:[%s2265_s1 + $0x28] sm:$0xff]  ;;  %v590_v15 = vld [vmem:[%s2266_s2 + $0x20] sm:$0xff]  ;;  %v236_v17 = vld [vmem:[%s2265_s1 + $0x30] sm:$0xff] }
   0x5   :  { %1308 = vmatpush1.bf16.msra.mxu0 %v1307_v5  ;;  %1370 = vmatpush1.bf16.msra.mxu1 %v1307_v5  ;;  %v591_v14 = vld [vmem:[%s2266_s2 + $0x28] sm:$0xff]  ;;  %v1313_v16 = vpack.c.bf16 %v235_v13, %v234_v12  ;;  %v237_v18 = vld [vmem:[%s2265_s1 + $0x38] sm:$0xff]  ;;  %v592_v20 = vld [vmem:[%s2266_s2 + $0x30] sm:$0xff] }
   0x6   :  { %1309 = vmatprep.subr.bf16.mxu0 %v1482_v8  ;;  %1355 = vmatprep.subr.bf16.mxu1 %v1482_v8  ;;  %v593_v19 = vld [vmem:[%s2266_s2 + $0x38] sm:$0xff]  ;;  %v1316_v21 = vpack.c.bf16 %v237_v18, %v236_v17  ;;  %v238_v22 = vld [vmem:[%s2265_s1 + $0x40] sm:$0xff]  ;;  %v239_v23 = vld [vmem:[%s2265_s1 + $0x48] sm:$0xff] }
   0x7   :  { %635 = vperm.xlu1 %1392, %v589_v9   ;;  %625 = vperm.xlu0 %1391, %v587_v10   ;;  %v595_v24 = vld [vmem:[%s2266_s2 + $0x48] sm:$0xff]  ;;  %v594_v25 = vld [vmem:[%s2266_s2 + $0x40] sm:$0xff]  ;;  %v1319_v26 = vpack.c.bf16 %v239_v23, %v238_v22  ;;  %v240_v27 = vld [vmem:[%s2265_s1 + $0x50] sm:$0xff] }
   0x8   :  { %v241_v28 = vld [vmem:[%s2265_s1 + $0x58] sm:$0xff]  ;;  %v596_v30 = vld [vmem:[%s2266_s2 + $0x50] sm:$0xff]  ;;  %v242_v32 = vld [vmem:[%s2265_s1 + $0x60] sm:$0xff] }
   0x9   :  { %1311 = vmatpush1.bf16.msra.mxu0 %v1310_v11  ;;  %1371 = vmatpush1.bf16.msra.mxu1 %v1310_v11  ;;  %v597_v29 = vld [vmem:[%s2266_s2 + $0x58] sm:$0xff]  ;;  %v1322_v31 = vpack.c.bf16 %v241_v28, %v240_v27  ;;  %v243_v33 = vld [vmem:[%s2265_s1 + $0x68] sm:$0xff]  ;;  %v598_v39 = vld [vmem:[%s2266_s2 + $0x60] sm:$0xff] }
   0xa   :  { %1312 = vmatprep.subr.bf16.mxu0 %v1482_v8  ;;  %1356 = vmatprep.subr.bf16.mxu1 %v1482_v8  ;;  %v1604_v34 = vld [vmem:[%s2264_s0 + $0x8] sm:$0xff]  ;;  %v1325_v40 = vpack.c.bf16 %v243_v33, %v242_v32  ;;  %v244_v43 = vld [vmem:[%s2265_s1 + $0x70] sm:$0xff]  ;;  %v245_v44 = vld [vmem:[%s2265_s1 + $0x78] sm:$0xff] }
   0xb   :  { %645 = vperm.xlu1 %1392, %v591_v14   ;;  %640 = vperm.xlu0 %1391, %v590_v15   ;;  %v1609_v35 = vld [vmem:[%s2264_s0 + $0x48] sm:$0xff]  ;;  %v71_v36 = vunpack.c.0.s8 %v1604_v34  ;;  %v601_v45 = vld [vmem:[%s2266_s2 + $0x78] sm:$0xff]  ;;  %v600_v46 = vld [vmem:[%s2266_s2 + $0x70] sm:$0xff]  ;;  %v1328_v47 = vpack.c.bf16 %v245_v44, %v244_v43 }
   0xc   :  { %v103_v37 = vunpack.c.0.s8 %v1609_v35  ;;  %v599_v38 = vld [vmem:[%s2266_s2 + $0x68] sm:$0xff]  ;;  %v246_v48 = vld [vmem:[%s2265_s1 + $0x80] sm:$0xff]  ;;  %v248_v53 = vld [vmem:[%s2265_s1 + $0x90] sm:$0xff] }
   0xd   :  { %1314 = vmatpush1.bf16.msra.mxu0 %v1313_v16  ;;  %1372 = vmatpush1.bf16.msra.mxu1 %v1313_v16  ;;  %v135_v41 = vcvt.s32.f32 %v71_v36  ;;  %v247_v49 = vld [vmem:[%s2265_s1 + $0x88] sm:$0xff]  ;;  %v602_v51 = vld [vmem:[%s2266_s2 + $0x80] sm:$0xff]  ;;  %v249_v54 = vld [vmem:[%s2265_s1 + $0x98] sm:$0xff] }
   0xe   :  { %1315 = vmatprep.subr.bf16.mxu0 %v1482_v8  ;;  %1357 = vmatprep.subr.bf16.mxu1 %v1482_v8  ;;  %v167_v42 = vcvt.s32.f32 %v103_v37  ;;  %v603_v50 = vld [vmem:[%s2266_s2 + $0x88] sm:$0xff]  ;;  %v1331_v52 = vpack.c.bf16 %v247_v49, %v246_v48  ;;  %v605_v55 = vld [vmem:[%s2266_s2 + $0x98] sm:$0xff]  ;;  %v604_v56 = vld [vmem:[%s2266_s2 + $0x90] sm:$0xff]  ;;  %v1334_v57 = vpack.c.bf16 %v249_v54, %v248_v53 }
   0xf   :  { %655 = vperm.xlu1 %1392, %v593_v19   ;;  %650 = vperm.xlu0 %1391, %v592_v20   ;;  %v250_v58 = vld [vmem:[%s2265_s1 + $0xa0] sm:$0xff]  ;;  %v251_v59 = vld [vmem:[%s2265_s1 + $0xa8] sm:$0xff] }
  0x10   :  { %326 = vmatprep.mubr.f32.mxu0 %v135_v41  ;;  %406 = vmatprep.mubr.f32.mxu1 %v167_v42 }
  0x11   :  { %1317 = vmatpush1.bf16.msra.mxu0 %v1316_v21  ;;  %1373 = vmatpush1.bf16.msra.mxu1 %v1316_v21 }
  0x12   :  { %1318 = vmatprep.subr.bf16.mxu0 %v1482_v8  ;;  %1358 = vmatprep.subr.bf16.mxu1 %v1482_v8 }
  0x13   :  { %665 = vperm.xlu1 %1392, %v595_v24   ;;  %660 = vperm.xlu0 %1391, %v594_v25  }
  0x15   :  { %1320 = vmatpush1.bf16.msra.mxu0 %v1319_v26  ;;  %1374 = vmatpush1.bf16.msra.mxu1 %v1319_v26 }
  0x16   :  { %1321 = vmatprep.subr.bf16.mxu0 %v1482_v8  ;;  %1359 = vmatprep.subr.bf16.mxu1 %v1482_v8 }
  0x17   :  { %675 = vperm.xlu1 %1392, %v597_v29   ;;  %670 = vperm.xlu0 %1391, %v596_v30  }
  0x19   :  { %1323 = vmatpush1.bf16.msra.mxu0 %v1322_v31  ;;  %1375 = vmatpush1.bf16.msra.mxu1 %v1322_v31 }
  0x1a   :  { %1324 = vmatprep.subr.bf16.mxu0 %v1482_v8  ;;  %1360 = vmatprep.subr.bf16.mxu1 %v1482_v8 }
  0x1b   :  { %685 = vperm.xlu1 %1392, %v599_v38   ;;  %680 = vperm.xlu0 %1391, %v598_v39  }
  0x1d   :  { %1326 = vmatpush1.bf16.msra.mxu0 %v1325_v40  ;;  %1376 = vmatpush1.bf16.msra.mxu1 %v1325_v40 }
  0x1e   :  { %1327 = vmatprep.subr.bf16.mxu0 %v1482_v8  ;;  %1361 = vmatprep.subr.bf16.mxu1 %v1482_v8 }
  0x1f   :  { %695 = vperm.xlu1 %1392, %v601_v45   ;;  %690 = vperm.xlu0 %1391, %v600_v46  }
  0x21   :  { %1329 = vmatpush1.bf16.msra.mxu0 %v1328_v47  ;;  %1377 = vmatpush1.bf16.msra.mxu1 %v1328_v47 }
  0x22   :  { %1330 = vmatprep.subr.bf16.mxu0 %v1482_v8  ;;  %1362 = vmatprep.subr.bf16.mxu1 %v1482_v8 }
  0x23   :  { %705 = vperm.xlu1 %1392, %v603_v50   ;;  %700 = vperm.xlu0 %1391, %v602_v51  }
  0x25   :  { %1332 = vmatpush1.bf16.msra.mxu0 %v1331_v52  ;;  %1378 = vmatpush1.bf16.msra.mxu1 %v1331_v52 }
  0x26   :  { %1333 = vmatprep.subr.bf16.mxu0 %v1482_v8  ;;  %1363 = vmatprep.subr.bf16.mxu1 %v1482_v8 }
  0x27   :  { %9 = vsyncpa [#allocation4], 0  ;;  %715 = vperm.xlu1 %1392, %v605_v55   ;;  %710 = vperm.xlu0 %1391, %v604_v56   ;;  %v607_v60 = vld [vmem:[%s2266_s2 + $0xa8] sm:$0xff]  ;;  %v606_v61 = vld [vmem:[%s2266_s2 + $0xa0] sm:$0xff]  ;;  %v1337_v62 = vpack.c.bf16 %v251_v59, %v250_v58  ;;  %v73_v29 = vunpack.c.1.s8 %v1604_v34  ;;  %v105_v30 = vunpack.c.1.s8 %v1609_v35  ;;  %v75_v40 = vunpack.c.2.s8 %v1604_v34 }
  0x28   :  { %v252_v63 = vld [vmem:[%s2265_s1 + $0xb0] sm:$0xff]  ;;  %v253_v0 = vld [vmem:[%s2265_s1 + $0xb8] sm:$0xff]  ;;  %v254_v4 = vld [vmem:[%s2265_s1 + $0xc0] sm:$0xff]  ;;  %v107_v41 = vunpack.c.2.s8 %v1609_v35  ;;  %v77_v50 = vunpack.c.3.s8 %v1604_v34  ;;  %v109_v51 = vunpack.c.3.s8 %v1609_v35 }
  0x29   :  { %1335 = vmatpush1.bf16.msra.mxu0 %v1334_v57  ;;  %1379 = vmatpush1.bf16.msra.mxu1 %v1334_v57  ;;  %v609_v1 = vld [vmem:[%s2266_s2 + $0xb8] sm:$0xff]  ;;  %v608_v2 = vld [vmem:[%s2266_s2 + $0xb0] sm:$0xff]  ;;  %v1340_v3 = vpack.c.bf16 %v253_v0, %v252_v63  ;;  %v255_v5 = vld [vmem:[%s2265_s1 + $0xc8] sm:$0xff]  ;;  %v137_v39 = vcvt.s32.f32 %v73_v29  ;;  %v139_v48 = vcvt.s32.f32 %v75_v40 }
  0x2a   :  { %1336 = vmatprep.subr.bf16.mxu0 %v1482_v8  ;;  %1364 = vmatprep.subr.bf16.mxu1 %v1482_v8  ;;  %v611_v6 = vld [vmem:[%s2266_s2 + $0xc8] sm:$0xff]  ;;  %v610_v7 = vld [vmem:[%s2266_s2 + $0xc0] sm:$0xff]  ;;  %v1343_v9 = vpack.c.bf16 %v255_v5, %v254_v4  ;;  %v256_v10 = vld [vmem:[%s2265_s1 + $0xd0] sm:$0xff]  ;;  %v171_v49 = vcvt.s32.f32 %v107_v41  ;;  %v141_v58 = vcvt.s32.f32 %v77_v50  ;;  %v173_v59 = vcvt.s32.f32 %v109_v51 }
  0x2b   :  { %725 = vperm.xlu1 %1392, %v607_v60   ;;  %720 = vperm.xlu0 %1391, %v606_v61   ;;  %v257_v11 = vld [vmem:[%s2265_s1 + $0xd8] sm:$0xff]  ;;  %v612_v13 = vld [vmem:[%s2266_s2 + $0xd0] sm:$0xff]  ;;  %v258_v15 = vld [vmem:[%s2265_s1 + $0xe0] sm:$0xff] }
  0x2c   :  { %v613_v12 = vld [vmem:[%s2266_s2 + $0xd8] sm:$0xff]  ;;  %v1346_v14 = vpack.c.bf16 %v257_v11, %v256_v10  ;;  %v259_v16 = vld [vmem:[%s2265_s1 + $0xe8] sm:$0xff]  ;;  %v614_v18 = vld [vmem:[%s2266_s2 + $0xe0] sm:$0xff] }
  0x2d   :  { %1338 = vmatpush1.bf16.msra.mxu0 %v1337_v62  ;;  %1380 = vmatpush1.bf16.msra.mxu1 %v1337_v62  ;;  %v615_v17 = vld [vmem:[%s2266_s2 + $0xe8] sm:$0xff]  ;;  %v1349_v19 = vpack.c.bf16 %v259_v16, %v258_v15  ;;  %v1734_v20 = vld [vmem:[%s2264_s0] sm:$0xff]  ;;  %v260_v22 = vld [vmem:[%s2265_s1 + $0xf0] sm:$0xff] }
  0x2e   :  { %1339 = vmatprep.subr.bf16.mxu0 %v1482_v8  ;;  %1365 = vmatprep.subr.bf16.mxu1 %v1482_v8  ;;  %v1739_v21 = vld [vmem:[%s2264_s0 + $0x40] sm:$0xff]  ;;  %v261_v23 = vld [vmem:[%s2265_s1 + $0xf8] sm:$0xff]  ;;  %v616_v25 = vld [vmem:[%s2266_s2 + $0xf0] sm:$0xff]  ;;  %v70_v26 = vunpack.c.0.s8 %v1734_v20  ;;  %v72_v37 = vunpack.c.1.s8 %v1734_v20  ;;  %v74_v46 = vunpack.c.2.s8 %v1734_v20  ;;  %v76_v56 = vunpack.c.3.s8 %v1734_v20 }
  0x2f   :  { %735 = vperm.xlu1 %1392, %v609_v1   ;;  %730 = vperm.xlu0 %1391, %v608_v2   ;;  %v617_v24 = vld [vmem:[%s2266_s2 + $0xf8] sm:$0xff]  ;;  %v102_v27 = vunpack.c.0.s8 %v1739_v21  ;;  %v1352_v28 = vpack.c.bf16 %v261_v23, %v260_v22  ;;  %v811_v31 = vld [vmem:[%s2267_s3 + $0x8] sm:$0xff]  ;;  %v810_v32 = vld [vmem:[%s2267_s3] sm:$0xff]  ;;  %v104_v38 = vunpack.c.1.s8 %v1739_v21  ;;  %v106_v47 = vunpack.c.2.s8 %v1739_v21 }
  0x30   :  { %v134_v33 = vcvt.s32.f32 %v70_v26  ;;  %v813_v42 = vld [vmem:[%s2267_s3 + $0x18] sm:$0xff]  ;;  %v812_v43 = vld [vmem:[%s2267_s3 + $0x10] sm:$0xff]  ;;  %v136_v44 = vcvt.s32.f32 %v72_v37  ;;  %v815_v34 = vld [vmem:[%s2267_s3 + $0x28] sm:$0xff]  ;;  %v138_v54 = vcvt.s32.f32 %v74_v46  ;;  %v108_v57 = vunpack.c.3.s8 %v1739_v21 }
  0x31   :  { %1341 = vmatpush1.bf16.msra.mxu0 %v1340_v3  ;;  %1381 = vmatpush1.bf16.msra.mxu1 %v1340_v3  ;;  %v166_v36 = vcvt.s32.f32 %v102_v27  ;;  %v168_v45 = vcvt.s32.f32 %v104_v38  ;;  %v1784_v52 = vld [vmem:[%s2264_s0 + $0x18] sm:$0xff]  ;;  %v814_v35 = vld [vmem:[%s2267_s3 + $0x20] sm:$0xff]  ;;  %v170_v55 = vcvt.s32.f32 %v106_v47  ;;  %v1804_v62 = vld [vmem:[%s2264_s0 + $0x10] sm:$0xff]  ;;  %v140_v2 = vcvt.s32.f32 %v76_v56 }
  0x32   :  { %1342 = vmatprep.subr.bf16.mxu0 %v1482_v8  ;;  %1366 = vmatprep.subr.bf16.mxu1 %v1482_v8  ;;  %v1789_v53 = vld [vmem:[%s2264_s0 + $0x58] sm:$0xff]  ;;  %v79_v60 = vunpack.c.0.s8 %v1784_v52  ;;  %v1809_v63 = vld [vmem:[%s2264_s0 + $0x50] sm:$0xff]  ;;  %v172_v3 = vcvt.s32.f32 %v108_v57  ;;  %v78_v4 = vunpack.c.0.s8 %v1804_v62  ;;  %v819_v11 = vld [vmem:[%s2267_s3 + $0x48] sm:$0xff]  ;;  %v80_v15 = vunpack.c.1.s8 %v1804_v62 }
  0x33   :  { %745 = vperm.xlu1 %1392, %v611_v6   ;;  %740 = vperm.xlu0 %1391, %v610_v7   ;;  %v111_v61 = vunpack.c.0.s8 %v1789_v53  ;;  %v817_v0 = vld [vmem:[%s2267_s3 + $0x38] sm:$0xff]  ;;  %v816_v1 = vld [vmem:[%s2267_s3 + $0x30] sm:$0xff]  ;;  %v110_v5 = vunpack.c.0.s8 %v1809_v63  ;;  %v113_v10 = vunpack.c.1.s8 %v1789_v53  ;;  %v112_v16 = vunpack.c.1.s8 %v1809_v63 }
  0x34   :  { %v143_v6 = vcvt.s32.f32 %v79_v60  ;;  %v115_v20 = vunpack.c.2.s8 %v1789_v53  ;;  %v821_v21 = vld [vmem:[%s2267_s3 + $0x58] sm:$0xff]  ;;  %v820_v22 = vld [vmem:[%s2267_s3 + $0x50] sm:$0xff]  ;;  %v144_v23 = vcvt.s32.f32 %v80_v15  ;;  %v114_v26 = vunpack.c.2.s8 %v1809_v63 }
  0x35   :  { %1344 = vmatpush1.bf16.msra.mxu0 %v1343_v9  ;;  %1382 = vmatpush1.bf16.msra.mxu1 %v1343_v9  ;;  %v175_v7 = vcvt.s32.f32 %v111_v61  ;;  %v81_v9 = vunpack.c.1.s8 %v1784_v52  ;;  %v85_v29 = vunpack.c.3.s8 %v1784_v52  ;;  %v825_v46 = vld [vmem:[%s2267_s3 + $0x78] sm:$0xff]  ;;  %v824_v47 = vld [vmem:[%s2267_s3 + $0x70] sm:$0xff] }
  0x36   :  { %1345 = vmatprep.subr.bf16.mxu0 %v1482_v8  ;;  %1367 = vmatprep.subr.bf16.mxu1 %v1482_v8  ;;  %v178_v38 = vcvt.s32.f32 %v114_v26  ;;  %v832_v26 = vld [vmem:[%s2267_s3 + $0xb0] sm:$0xff] }
  0x37   :  { %755 = vperm.xlu1 %1392, %v613_v12   ;;  %750 = vperm.xlu0 %1391, %v612_v13   ;;  %v818_v12 = vld [vmem:[%s2267_s3 + $0x40] sm:$0xff]  ;;  %v142_v13 = vcvt.s32.f32 %v78_v4  ;;  %v149_v40 = vcvt.s32.f32 %v85_v29 }
  0x39   :  { %1347 = vmatpush1.bf16.msra.mxu0 %v1346_v14  ;;  %1383 = vmatpush1.bf16.msra.mxu1 %v1346_v14  ;;  %v174_v14 = vcvt.s32.f32 %v110_v5 }
  0x3a   :  { %1348 = vmatprep.subr.bf16.mxu0 %v1482_v8  ;;  %1368 = vmatprep.subr.bf16.mxu1 %v1482_v8 }
  0x3b   :  { %765 = vperm.xlu1 %1392, %v615_v17   ;;  %760 = vperm.xlu0 %1391, %v614_v18   ;;  %v145_v17 = vcvt.s32.f32 %v81_v9  ;;  %v177_v18 = vcvt.s32.f32 %v113_v10 }
  0x3d   :  { %1350 = vmatpush1.bf16.msra.mxu0 %v1349_v19  ;;  %1384 = vmatpush1.bf16.msra.mxu1 %v1349_v19  ;;  %v83_v19 = vunpack.c.2.s8 %v1784_v52 }
  0x3e   :  { %1351 = vmatprep.subr.bf16.mxu0 %v1482_v8  ;;  %1369 = vmatprep.subr.bf16.mxu1 %v1482_v8  ;;  %v169_v8 = vcvt.s32.f32 %v105_v30  ;;  %v117_v30 = vunpack.c.3.s8 %v1789_v53 }
  0x3f   :  { %775 = vperm.xlu1 %1392, %v617_v24   ;;  %770 = vperm.xlu0 %1391, %v616_v25   ;;  %v176_v24 = vcvt.s32.f32 %v112_v16  ;;  %v82_v25 = vunpack.c.2.s8 %v1804_v62  ;;  %v147_v27 = vcvt.s32.f32 %v83_v19 }
  0x40   :  { %v181_v41 = vcvt.s32.f32 %v117_v30 }
  0x41   :  { %1353 = vmatpush1.bf16.msra.mxu0 %v1352_v28  ;;  %1385 = vmatpush1.bf16.msra.mxu1 %v1352_v28  ;;  %v179_v28 = vcvt.s32.f32 %v115_v20  ;;  %v146_v37 = vcvt.s32.f32 %v82_v25  ;;  %v833_v25 = vld [vmem:[%s2267_s3 + $0xb8] sm:$0xff] }
  0x43   :  { %849 = vperm.xlu1 %1392, %v811_v31   ;;  %844 = vperm.xlu0 %1391, %v810_v32   ;;  %v1844_v31 = vld [vmem:[%s2264_s0 + $0x28] sm:$0xff] }
  0x44   :  { %327 = vmatmul.mubr.f32.vlgmr.msra.gmra.mrb[0].mxu0 %v134_v33  ;;  %407 = vmatmul.mubr.f32.vlgmr.msra.gmra.mrb[0].mxu1 %v166_v36  ;;  %v1849_v32 = vld [vmem:[%s2264_s0 + $0x68] sm:$0xff]  ;;  %v822_v36 = vld [vmem:[%s2267_s3 + $0x60] sm:$0xff]  ;;  %v93_v9 = vunpack.c.3.s8 %v1844_v31 }
  0x45   :  { %331 = vmatprep.mubr.f32.mxu0 %v137_v39  ;;  %411 = vmatprep.mubr.f32.mxu1 %v169_v8  ;;  %v823_v33 = vld [vmem:[%s2267_s3 + $0x68] sm:$0xff]  ;;  %v84_v39 = vunpack.c.3.s8 %v1804_v62  ;;  %v116_v8 = vunpack.c.3.s8 %v1809_v63  ;;  %v91_v62 = vunpack.c.2.s8 %v1844_v31  ;;  %v123_v63 = vunpack.c.2.s8 %v1849_v32 }
  0x46   :  { %v125_v10 = vunpack.c.3.s8 %v1849_v32  ;;  %v157_v19 = vcvt.s32.f32 %v93_v9 }
  0x47   :  { %859 = vperm.xlu1 %1392, %v813_v42   ;;  %854 = vperm.xlu0 %1391, %v812_v43   ;;  %v87_v42 = vunpack.c.0.s8 %v1844_v31  ;;  %v119_v43 = vunpack.c.0.s8 %v1849_v32 }
  0x48   :  { %332 = vmatmul.mubr.f32.gmra.mrb[2].mxu0 %v136_v44  ;;  %412 = vmatmul.mubr.f32.gmra.mrb[2].mxu1 %v168_v45  ;;  %v1864_v44 = vld [vmem:[%s2264_s0 + $0x20] sm:$0xff]  ;;  %v189_v20 = vcvt.s32.f32 %v125_v10 }
  0x49   :  { %336 = vmatprep.mubr.f32.mxu0 %v139_v48  ;;  %416 = vmatprep.mubr.f32.mxu1 %v171_v49  ;;  %v1869_v45 = vld [vmem:[%s2264_s0 + $0x60] sm:$0xff]  ;;  %v148_v48 = vcvt.s32.f32 %v84_v39  ;;  %v180_v49 = vcvt.s32.f32 %v116_v8  ;;  %v86_v50 = vunpack.c.0.s8 %v1864_v44  ;;  %v151_v52 = vcvt.s32.f32 %v87_v42 }
  0x4a   :  { %v118_v51 = vunpack.c.0.s8 %v1869_v45  ;;  %v183_v53 = vcvt.s32.f32 %v119_v43  ;;  %v90_v4 = vunpack.c.2.s8 %v1864_v44  ;;  %v122_v5 = vunpack.c.2.s8 %v1869_v45 }
  0x4b   :  { %869 = vperm.xlu1 %1392, %v815_v34   ;;  %864 = vperm.xlu0 %1391, %v814_v35   ;;  %v89_v34 = vunpack.c.1.s8 %v1844_v31  ;;  %v121_v35 = vunpack.c.1.s8 %v1849_v32  ;;  %v150_v56 = vcvt.s32.f32 %v86_v50 }
  0x4c   :  { %337 = vmatmul.mubr.f32.gmra.mrb[4].mxu0 %v138_v54  ;;  %417 = vmatmul.mubr.f32.gmra.mrb[4].mxu1 %v170_v55  ;;  %v827_v54 = vld [vmem:[%s2267_s3 + $0x88] sm:$0xff]  ;;  %v826_v55 = vld [vmem:[%s2267_s3 + $0x80] sm:$0xff]  ;;  %v182_v57 = vcvt.s32.f32 %v118_v51  ;;  %v154_v15 = vcvt.s32.f32 %v90_v4  ;;  %v186_v16 = vcvt.s32.f32 %v122_v5 }
  0x4d   :  { %341 = vmatprep.mubr.f32.mxu0 %v141_v58  ;;  %421 = vmatprep.mubr.f32.mxu1 %v173_v59  ;;  %v88_v58 = vunpack.c.1.s8 %v1864_v44  ;;  %v120_v59 = vunpack.c.1.s8 %v1869_v45  ;;  %v153_v60 = vcvt.s32.f32 %v89_v34  ;;  %v185_v61 = vcvt.s32.f32 %v121_v35 }
  0x4f   :  { %879 = vperm.xlu1 %1392, %v817_v0   ;;  %874 = vperm.xlu0 %1391, %v816_v1   ;;  %v829_v0 = vld [vmem:[%s2267_s3 + $0x98] sm:$0xff]  ;;  %v828_v1 = vld [vmem:[%s2267_s3 + $0x90] sm:$0xff] }
  0x50   :  { %342 = vmatmul.mubr.f32.gmra.mrb[6].mxu0 %v140_v2  ;;  %422 = vmatmul.mubr.f32.gmra.mrb[6].mxu1 %v172_v3  ;;  %v152_v2 = vcvt.s32.f32 %v88_v58  ;;  %v184_v3 = vcvt.s32.f32 %v120_v59 }
  0x51   :  { %346 = vmatprep.mubr.f32.mxu0 %v143_v6  ;;  %426 = vmatprep.mubr.f32.mxu1 %v175_v7  ;;  %v155_v6 = vcvt.s32.f32 %v91_v62  ;;  %v187_v7 = vcvt.s32.f32 %v123_v63  ;;  %v841_v62 = vld [vmem:[%s2267_s3 + $0xf8] sm:$0xff]  ;;  %v840_v63 = vld [vmem:[%s2267_s3 + $0xf0] sm:$0xff] }
  0x53   :  { %889 = vperm.xlu1 %1392, %v819_v11   ;;  %884 = vperm.xlu0 %1391, %v818_v12   ;;  %v1904_v11 = vld [vmem:[%s2264_s0 + $0x38] sm:$0xff] }
  0x54   :  { %347 = vmatmul.mubr.f32.gmra.mrb[8].mxu0 %v142_v13  ;;  %427 = vmatmul.mubr.f32.gmra.mrb[8].mxu1 %v174_v14  ;;  %v1909_v12 = vld [vmem:[%s2264_s0 + $0x78] sm:$0xff]  ;;  %v831_v13 = vld [vmem:[%s2267_s3 + $0xa8] sm:$0xff]  ;;  %v830_v14 = vld [vmem:[%s2267_s3 + $0xa0] sm:$0xff]  ;;  %v101_v34 = vunpack.c.3.s8 %v1904_v11 }
  0x55   :  { %351 = vmatprep.mubr.f32.mxu0 %v145_v17  ;;  %431 = vmatprep.mubr.f32.mxu1 %v177_v18  ;;  %v92_v17 = vunpack.c.3.s8 %v1864_v44  ;;  %v124_v18 = vunpack.c.3.s8 %v1869_v45  ;;  %v99_v44 = vunpack.c.2.s8 %v1904_v11  ;;  %v131_v45 = vunpack.c.2.s8 %v1909_v12 }
  0x56   :  { %v133_v35 = vunpack.c.3.s8 %v1909_v12 }
  0x57   :  { %899 = vperm.xlu1 %1392, %v821_v21   ;;  %894 = vperm.xlu0 %1391, %v820_v22   ;;  %v95_v21 = vunpack.c.0.s8 %v1904_v11  ;;  %v127_v22 = vunpack.c.0.s8 %v1909_v12 }
  0x58   :  { %352 = vmatmul.mubr.f32.gmra.mrb[10].mxu0 %v144_v23  ;;  %432 = vmatmul.mubr.f32.gmra.mrb[10].mxu1 %v176_v24  ;;  %v1924_v23 = vld [vmem:[%s2264_s0 + $0x30] sm:$0xff] }
  0x59   :  { %356 = vmatprep.mubr.f32.mxu0 %v147_v27  ;;  %436 = vmatprep.mubr.f32.mxu1 %v179_v28  ;;  %v1929_v24 = vld [vmem:[%s2264_s0 + $0x70] sm:$0xff]  ;;  %v156_v27 = vcvt.s32.f32 %v92_v17  ;;  %v188_v28 = vcvt.s32.f32 %v124_v18  ;;  %v94_v29 = vunpack.c.0.s8 %v1924_v23  ;;  %v159_v31 = vcvt.s32.f32 %v95_v21 }
  0x5a   :  { %v126_v30 = vunpack.c.0.s8 %v1929_v24  ;;  %v191_v32 = vcvt.s32.f32 %v127_v22  ;;  %v98_v50 = vunpack.c.2.s8 %v1924_v23  ;;  %v130_v51 = vunpack.c.2.s8 %v1929_v24 }
  0x5b   :  { %909 = vperm.xlu1 %1392, %v823_v33   ;;  %904 = vperm.xlu0 %1391, %v822_v36   ;;  %v97_v33 = vunpack.c.1.s8 %v1904_v11  ;;  %v129_v36 = vunpack.c.1.s8 %v1909_v12  ;;  %v158_v39 = vcvt.s32.f32 %v94_v29  ;;  %v100_v58 = vunpack.c.3.s8 %v1924_v23 }
  0x5c   :  { %357 = vmatmul.mubr.f32.gmra.mrb[12].mxu0 %v146_v37  ;;  %437 = vmatmul.mubr.f32.gmra.mrb[12].mxu1 %v178_v38  ;;  %v835_v37 = vld [vmem:[%s2267_s3 + $0xc8] sm:$0xff]  ;;  %v834_v38 = vld [vmem:[%s2267_s3 + $0xc0] sm:$0xff]  ;;  %v190_v8 = vcvt.s32.f32 %v126_v30  ;;  %v132_v59 = vunpack.c.3.s8 %v1929_v24 }
  0x5d   :  { %361 = vmatprep.mubr.f32.mxu0 %v149_v40  ;;  %441 = vmatprep.mubr.f32.mxu1 %v181_v41  ;;  %v96_v40 = vunpack.c.1.s8 %v1924_v23  ;;  %v128_v41 = vunpack.c.1.s8 %v1929_v24  ;;  %v161_v42 = vcvt.s32.f32 %v97_v33  ;;  %v193_v43 = vcvt.s32.f32 %v129_v36 }
  0x5f   :  { %919 = vperm.xlu1 %1392, %v825_v46   ;;  %914 = vperm.xlu0 %1391, %v824_v47   ;;  %v837_v46 = vld [vmem:[%s2267_s3 + $0xd8] sm:$0xff]  ;;  %v836_v47 = vld [vmem:[%s2267_s3 + $0xd0] sm:$0xff] }
  0x60   :  { %362 = vmatmul.mubr.f32.gmra.mrb[14].mxu0 %v148_v48  ;;  %442 = vmatmul.mubr.f32.gmra.mrb[14].mxu1 %v180_v49  ;;  %v160_v48 = vcvt.s32.f32 %v96_v40  ;;  %v192_v49 = vcvt.s32.f32 %v128_v41 }
  0x61   :  { %366 = vmatprep.mubr.f32.mxu0 %v151_v52  ;;  %446 = vmatprep.mubr.f32.mxu1 %v183_v53  ;;  %v163_v52 = vcvt.s32.f32 %v99_v44  ;;  %v195_v53 = vcvt.s32.f32 %v131_v45 }
  0x63   :  { %929 = vperm.xlu1 %1392, %v827_v54   ;;  %924 = vperm.xlu0 %1391, %v826_v55   ;;  %v839_v54 = vld [vmem:[%s2267_s3 + $0xe8] sm:$0xff]  ;;  %v838_v55 = vld [vmem:[%s2267_s3 + $0xe0] sm:$0xff]  ;;  %s1483_s3 = smov [#allocation3]  }
  0x64   :  { %367 = vmatmul.mubr.f32.gmra.mrb[16].mxu0 %v150_v56  ;;  %447 = vmatmul.mubr.f32.gmra.mrb[16].mxu1 %v182_v57  ;;  %v162_v56 = vcvt.s32.f32 %v98_v50  ;;  %v194_v57 = vcvt.s32.f32 %v130_v51  ;;  %s1295_s22 = sshll.u32 %s1483_s3, 4  ;;  %s1296_s22 = int_to_ptr.vmem [resolvable:$true] %s1295_s22 }
  0x65   :  { %371 = vmatprep.mubr.f32.mxu0 %v153_v60  ;;  %451 = vmatprep.mubr.f32.mxu1 %v185_v61  ;;  %v165_v60 = vcvt.s32.f32 %v101_v34  ;;  %v197_v61 = vcvt.s32.f32 %v133_v35  ;;  %s1457_s23 = scalar_lea.vmem %s1296_s22, 4096  ;;  %p1462_p1 = scmp.lt.s32.totalorder %s1296_s22, %s1296_s22 }
  0x66   :  { %p1458_p0 = scmp.ne.s32.totalorder %s1296_s22, %s1457_s23  ;;  %p1463_p2 = scmp.lt.s32.totalorder %s1457_s23, %s1457_s23 }
  0x67   :  { %939 = vperm.xlu1 %1392, %v829_v0   ;;  %934 = vperm.xlu0 %1391, %v828_v1   ;;  %v164_v0 = vcvt.s32.f32 %v100_v58  ;;  %v196_v1 = vcvt.s32.f32 %v132_v59 }
  0x68   :  { %372 = vmatmul.mubr.f32.gmra.mrb[18].mxu0 %v152_v2  ;;  %452 = vmatmul.mubr.f32.gmra.mrb[18].mxu1 %v184_v3  ;;  %p1464_p3 = por %p1463_p2, %p1462_p1 }
  0x69   :  { %376 = vmatprep.mubr.f32.mxu0 %v155_v6  ;;  %456 = vmatprep.mubr.f32.mxu1 %v187_v7 }
  0x6a   :  { %p1465_p4 = pnand %p1464_p3, %p1458_p0 }
  0x6b   :  { %949 = vperm.xlu1 %1392, %v831_v13   ;;  %944 = vperm.xlu0 %1391, %v830_v14  }
  0x6c   :  { %377 = vmatmul.mubr.f32.gmra.mrb[20].mxu0 %v154_v15  ;;  %457 = vmatmul.mubr.f32.gmra.mrb[20].mxu1 %v186_v16 }
  0x6d   :  { %381 = vmatprep.mubr.f32.mxu0 %v157_v19  ;;  %461 = vmatprep.mubr.f32.mxu1 %v189_v20 }
  0x6f   :  { %959 = vperm.xlu1 %1392, %v833_v25   ;;  %954 = vperm.xlu0 %1391, %v832_v26  }
  0x70   :  { %382 = vmatmul.mubr.f32.gmra.mrb[22].mxu0 %v156_v27  ;;  %462 = vmatmul.mubr.f32.gmra.mrb[22].mxu1 %v188_v28 }
  0x71   :  { %386 = vmatprep.mubr.f32.mxu0 %v159_v31  ;;  %466 = vmatprep.mubr.f32.mxu1 %v191_v32 }
  0x73   :  { %969 = vperm.xlu1 %1392, %v835_v37   ;;  %964 = vperm.xlu0 %1391, %v834_v38  }
  0x74   :  { %387 = vmatmul.mubr.f32.gmra.mrb[24].mxu0 %v158_v39  ;;  %467 = vmatmul.mubr.f32.gmra.mrb[24].mxu1 %v190_v8 }
  0x75   :  { %391 = vmatprep.mubr.f32.mxu0 %v161_v42  ;;  %471 = vmatprep.mubr.f32.mxu1 %v193_v43 }
  0x77   :  { %979 = vperm.xlu1 %1392, %v837_v46   ;;  %974 = vperm.xlu0 %1391, %v836_v47  }
  0x78   :  { %392 = vmatmul.mubr.f32.gmra.mrb[26].mxu0 %v160_v48  ;;  %472 = vmatmul.mubr.f32.gmra.mrb[26].mxu1 %v192_v49 }
  0x79   :  { %396 = vmatprep.mubr.f32.mxu0 %v163_v52  ;;  %476 = vmatprep.mubr.f32.mxu1 %v195_v53 }
  0x7b   :  { %989 = vperm.xlu1 %1392, %v839_v54   ;;  %984 = vperm.xlu0 %1391, %v838_v55  }
  0x7c   :  { %397 = vmatmul.mubr.f32.gmra.mrb[28].mxu0 %v162_v56  ;;  %477 = vmatmul.mubr.f32.gmra.mrb[28].mxu1 %v194_v57 }
  0x7d   :  { %401 = vmatprep.mubr.f32.mxu0 %v165_v60  ;;  %481 = vmatprep.mubr.f32.mxu1 %v197_v61 }
  0x7f   :  { %999 = vperm.xlu1 %1392, %v841_v62   ;;  %994 = vperm.xlu0 %1391, %v840_v63  }
  0x80   :  { %402 = vmatmul.mubr.f32.gmra.mrb[30].mxu0 %v164_v0  ;;  %482 = vmatmul.mubr.f32.gmra.mrb[30].mxu1 %v196_v1 }
  0x81   :  { %v621_v2 = vpop.permute.xlu0 %620  ;;  %v1975_v3 = vpop.permute.xlu1 %630 }
  0x86   :  { %v626_v4 = vpop.permute.xlu0 %625  ;;  %v1977_v5 = vpop.permute.xlu1 %635 }
  0x8a   :  { %v1979_v6 = vpop.permute.xlu0 %640  ;;  %v1981_v7 = vpop.permute.xlu1 %645 }
  0x8e   :  { %v1983_v9 = vpop.permute.xlu0 %650  ;;  %v1985_v10 = vpop.permute.xlu1 %655 }
  0x92   :  { %v1987_v11 = vpop.permute.xlu0 %660  ;;  %v1989_v12 = vpop.permute.xlu1 %665 }
  0x96   :  { %v1991_v13 = vpop.permute.xlu0 %670  ;;  %v1993_v14 = vpop.permute.xlu1 %675 }
  0x9a   :  { %v1995_v15 = vpop.permute.xlu0 %680  ;;  %v1997_v16 = vpop.permute.xlu1 %685 }
  0x9e   :  { %v1999_v17 = vpop.permute.xlu0 %690  ;;  %v2001_v18 = vpop.permute.xlu1 %695 }
  0xa2   :  { %v701_v19 = vpop.permute.xlu0 %700  ;;  %v706_v20 = vpop.permute.xlu1 %705 }
  0xa6   :  { %v711_v21 = vpop.permute.xlu0 %710  ;;  %v2003_v22 = vpop.permute.xlu1 %715 }
  0xaa   :  { %v2005_v23 = vpop.permute.xlu0 %720  ;;  %v2007_v24 = vpop.permute.xlu1 %725 }
  0xae   :  { %v2009_v25 = vpop.permute.xlu0 %730  ;;  %v2011_v26 = vpop.permute.xlu1 %735 }
  0xb2   :  { %v2013_v27 = vpop.permute.xlu0 %740  ;;  %v2015_v28 = vpop.permute.xlu1 %745 }
  0xb6   :  { %v2017_v29 = vpop.permute.xlu0 %750  ;;  %v2019_v30 = vpop.permute.xlu1 %755 }
  0xba   :  { %v2021_v31 = vpop.permute.xlu0 %760  ;;  %v2023_v32 = vpop.permute.xlu1 %765 }
  0xbe   :  { %v2025_v33 = vpop.permute.xlu0 %770  ;;  %v2027_v36 = vpop.permute.xlu1 %775 }
  0xc2   :  { %v845_v37 = vpop.permute.xlu0 %844  ;;  %v850_v38 = vpop.permute.xlu1 %849 }
  0xc6   :  { %v855_v39 = vpop.permute.xlu0 %854  ;;  %v860_v8 = vpop.permute.xlu1 %859 }
  0xca   :  { %v2029_v40 = vpop.permute.xlu0 %864  ;;  %v2031_v41 = vpop.permute.xlu1 %869 }
  0xce   :  { %v2033_v42 = vpop.permute.xlu0 %874  ;;  %v2035_v43 = vpop.permute.xlu1 %879 }
  0xd2   :  { %v2037_v44 = vpop.permute.xlu0 %884  ;;  %v2039_v45 = vpop.permute.xlu1 %889 }
  0xd6   :  { %v2041_v46 = vpop.permute.xlu0 %894  ;;  %v2043_v47 = vpop.permute.xlu1 %899 }
  0xda   :  { %v2045_v48 = vpop.permute.xlu0 %904  ;;  %v2047_v49 = vpop.permute.xlu1 %909 }
  0xde   :  { %v2049_v50 = vpop.permute.xlu0 %914  ;;  %v2051_v51 = vpop.permute.xlu1 %919 }
  0xe2   :  { %v925_v56 = vpop.permute.xlu0 %924 }
 0x117   :  { %v328_v52 = vpop.f32.mrb[0].mxu0  ;;  %v408_v53 = vpop.f32.mrb[0].mxu1 }
 0x118   :  { %v778_v34 = vmul.f32 %v621_v2, %v328_v52  ;;  %v794_v35 = vmul.f32 %v701_v19, %v408_v53  ;;  %v330_v54 = vpop.f32.mrb[1].mxu0  ;;  %v410_v55 = vpop.f32.mrb[1].mxu1 }
 0x119   :  { %v930_v19 = vpop.permute.xlu1 %929 }
 0x11a   :  { %v2053_v57 = vadd.f32 %v845_v37, %v778_v34  ;;  %v2055_v58 = vadd.f32 %v925_v56, %v794_v35 }
 0x11b   :  { %v333_v59 = vpop.f32.mrb[2].mxu0  ;;  %v413_v60 = vpop.f32.mrb[2].mxu1 }
 0x11c   :  { %v779_v61 = vmul.f32 %v626_v4, %v333_v59  ;;  %v795_v62 = vmul.f32 %v706_v20, %v413_v60  ;;  %v335_v63 = vpop.f32.mrb[3].mxu0  ;;  %v415_v0 = vpop.f32.mrb[3].mxu1  ;;  %v1050_v1 = vmul.f32 %v2055_v58, %v2055_v58  ;;  %v1034_v2 = vmul.f32 %v2053_v57, %v2053_v57 }
 0x11d   :  { %v935_v59 = vpop.permute.xlu0 %934 }
 0x11e   :  { %v2061_v52 = vadd.f32 %v850_v38, %v779_v61  ;;  %v2063_v53 = vadd.f32 %v930_v19, %v795_v62  ;;  %1098 = vadd.xlane.f32.xlu1 %v1050_v1  ;;  %1066 = vadd.xlane.f32.xlu0 %v1034_v2 }
 0x11f   :  { %v338_v37 = vpop.f32.mrb[4].mxu0  ;;  %v418_v34 = vpop.f32.mrb[4].mxu1 }
 0x120   :  { %v780_v4 = vmul.f32 %v1975_v3, %v338_v37  ;;  %v796_v20 = vmul.f32 %v711_v21, %v418_v34  ;;  %v340_v35 = vpop.f32.mrb[5].mxu0  ;;  %v420_v54 = vpop.f32.mrb[5].mxu1  ;;  %v1051_v55 = vmul.f32 %v2063_v53, %v2063_v53  ;;  %v1035_v56 = vmul.f32 %v2061_v52, %v2061_v52 }
 0x122   :  { %v2070_v38 = vadd.f32 %v855_v39, %v780_v4  ;;  %v2072_v60 = vadd.f32 %v935_v59, %v796_v20  ;;  %1100 = vadd.xlane.f32.xlu0 %v1051_v55  ;;  %1068 = vadd.xlane.f32.xlu1 %v1035_v56  ;;  %v940_v39 = vpop.permute.xlu1 %939  ;;  %v945_v55 = vpop.permute.xlu0 %944 }
 0x123   :  { %v343_v61 = vpop.f32.mrb[6].mxu0  ;;  %v423_v62 = vpop.f32.mrb[6].mxu1 }
 0x124   :  { %v781_v3 = vmul.f32 %v1977_v5, %v343_v61  ;;  %v797_v21 = vmul.f32 %v2003_v22, %v423_v62  ;;  %v345_v63 = vpop.f32.mrb[7].mxu0  ;;  %v425_v0 = vpop.f32.mrb[7].mxu1  ;;  %v1052_v1 = vmul.f32 %v2072_v60, %v2072_v60  ;;  %v1036_v2 = vmul.f32 %v2070_v38, %v2070_v38 }
 0x126   :  { %v2080_v19 = vadd.f32 %v860_v8, %v781_v3  ;;  %1102 = vadd.xlane.f32.xlu1 %v1052_v1  ;;  %1070 = vadd.xlane.f32.xlu0 %v1036_v2  ;;  %v2082_v37 = vadd.f32 %v940_v39, %v797_v21  ;;  %v950_v0 = vpop.permute.xlu1 %949 }
 0x127   :  { %v348_v34 = vpop.f32.mrb[8].mxu0  ;;  %v428_v4 = vpop.f32.mrb[8].mxu1 }
 0x128   :  { %v782_v5 = vmul.f32 %v1979_v6, %v348_v34  ;;  %v798_v22 = vmul.f32 %v2005_v23, %v428_v4  ;;  %v350_v20 = vpop.f32.mrb[9].mxu0  ;;  %v430_v35 = vpop.f32.mrb[9].mxu1  ;;  %v1037_v54 = vmul.f32 %v2080_v19, %v2080_v19  ;;  %v1053_v61 = vmul.f32 %v2082_v37, %v2082_v37 }
 0x12a   :  { %v2089_v56 = vadd.f32 %v2029_v40, %v782_v5  ;;  %1072 = vadd.xlane.f32.xlu0 %v1037_v54  ;;  %v2093_v62 = vadd.f32 %v945_v55, %v798_v22 }
 0x12b   :  { %v353_v8 = vpop.f32.mrb[10].mxu0  ;;  %v433_v59 = vpop.f32.mrb[10].mxu1 }
 0x12c   :  { %v783_v6 = vmul.f32 %v1981_v7, %v353_v8  ;;  %v799_v23 = vmul.f32 %v2007_v24, %v433_v59  ;;  %v355_v3 = vpop.f32.mrb[11].mxu0  ;;  %v435_v21 = vpop.f32.mrb[11].mxu1  ;;  %v1038_v63 = vmul.f32 %v2089_v56, %v2089_v56  ;;  %v1054_v5 = vmul.f32 %v2093_v62, %v2093_v62 }
 0x12e   :  { %v2100_v40 = vadd.f32 %v2031_v41, %v783_v6  ;;  %1104 = vadd.xlane.f32.xlu0 %v1053_v61  ;;  %1074 = vadd.xlane.f32.xlu1 %v1038_v63  ;;  %v2102_v1 = vadd.f32 %v950_v0, %v799_v23  ;;  %v955_v41 = vpop.permute.xlu0 %954 }
 0x12f   :  { %v358_v2 = vpop.f32.mrb[12].mxu0  ;;  %v438_v39 = vpop.f32.mrb[12].mxu1 }
 0x130   :  { %v784_v34 = vmul.f32 %v1983_v9, %v358_v2  ;;  %v800_v7 = vmul.f32 %v2009_v25, %v438_v39  ;;  %v360_v24 = vpop.f32.mrb[13].mxu0  ;;  %v440_v4 = vpop.f32.mrb[13].mxu1  ;;  %v1039_v22 = vmul.f32 %v2100_v40, %v2100_v40  ;;  %v1055_v9 = vmul.f32 %v2102_v1, %v2102_v1 }
 0x132   :  { %v2111_v20 = vadd.f32 %v2033_v42, %v784_v34  ;;  %1106 = vadd.xlane.f32.xlu1 %v1054_v5  ;;  %1076 = vadd.xlane.f32.xlu0 %v1039_v22  ;;  %v2115_v25 = vadd.f32 %v955_v41, %v800_v7  ;;  %v960_v42 = vpop.permute.xlu1 %959 }
 0x133   :  { %v363_v35 = vpop.f32.mrb[14].mxu0  ;;  %v443_v54 = vpop.f32.mrb[14].mxu1 }
 0x134   :  { %v785_v55 = vmul.f32 %v1985_v10, %v363_v35  ;;  %v801_v8 = vmul.f32 %v2011_v26, %v443_v54  ;;  %v365_v59 = vpop.f32.mrb[15].mxu0  ;;  %v445_v61 = vpop.f32.mrb[15].mxu1  ;;  %v1040_v6 = vmul.f32 %v2111_v20, %v2111_v20  ;;  %v1056_v39 = vmul.f32 %v2115_v25, %v2115_v25 }
 0x136   :  { %v2122_v23 = vadd.f32 %v2035_v43, %v785_v55  ;;  %1108 = vadd.xlane.f32.xlu0 %v1055_v9  ;;  %1078 = vadd.xlane.f32.xlu1 %v1040_v6  ;;  %v2124_v3 = vadd.f32 %v960_v42, %v801_v8  ;;  %v965_v43 = vpop.permute.xlu0 %964 }
 0x137   :  { %v368_v21 = vpop.f32.mrb[16].mxu0  ;;  %v448_v63 = vpop.f32.mrb[16].mxu1 }
 0x138   :  { %v786_v0 = vmul.f32 %v1987_v11, %v368_v21  ;;  %v802_v10 = vmul.f32 %v2013_v27, %v448_v63  ;;  %v370_v26 = vpop.f32.mrb[17].mxu0  ;;  %v450_v2 = vpop.f32.mrb[17].mxu1  ;;  %v1041_v34 = vmul.f32 %v2122_v23, %v2122_v23  ;;  %v1057_v11 = vmul.f32 %v2124_v3, %v2124_v3 }
 0x13a   :  { %v2133_v7 = vadd.f32 %v2037_v44, %v786_v0  ;;  %1110 = vadd.xlane.f32.xlu1 %v1056_v39  ;;  %1080 = vadd.xlane.f32.xlu0 %v1041_v34  ;;  %v2137_v27 = vadd.f32 %v965_v43, %v802_v10  ;;  %v970_v44 = vpop.permute.xlu1 %969 }
 0x13b   :  { %v373_v24 = vpop.f32.mrb[18].mxu0  ;;  %v453_v4 = vpop.f32.mrb[18].mxu1 }
 0x13c   :  { %v787_v5 = vmul.f32 %v1989_v12, %v373_v24  ;;  %v803_v22 = vmul.f32 %v2015_v28, %v453_v4  ;;  %v375_v41 = vpop.f32.mrb[19].mxu0  ;;  %v455_v35 = vpop.f32.mrb[19].mxu1  ;;  %v1042_v54 = vmul.f32 %v2133_v7, %v2133_v7  ;;  %v1058_v42 = vmul.f32 %v2137_v27, %v2137_v27 }
 0x13e   :  { %v2144_v9 = vadd.f32 %v2039_v45, %v787_v5  ;;  %1112 = vadd.xlane.f32.xlu0 %v1057_v11  ;;  %1082 = vadd.xlane.f32.xlu1 %v1042_v54  ;;  %v2146_v55 = vadd.f32 %v970_v44, %v803_v22  ;;  %v975_v45 = vpop.permute.xlu0 %974 }
 0x13f   :  { %v378_v8 = vpop.f32.mrb[20].mxu0  ;;  %v458_v59 = vpop.f32.mrb[20].mxu1 }
 0x140   :  { %v788_v61 = vmul.f32 %v1991_v13, %v378_v8  ;;  %v804_v12 = vmul.f32 %v2017_v29, %v458_v59  ;;  %v380_v28 = vpop.f32.mrb[21].mxu0  ;;  %v460_v6 = vpop.f32.mrb[21].mxu1  ;;  %v1043_v21 = vmul.f32 %v2144_v9, %v2144_v9  ;;  %v1059_v13 = vmul.f32 %v2146_v55, %v2146_v55 }
 0x142   :  { %v2155_v63 = vadd.f32 %v2041_v46, %v788_v61  ;;  %1114 = vadd.xlane.f32.xlu1 %v1058_v42  ;;  %1084 = vadd.xlane.f32.xlu0 %v1043_v21  ;;  %v2159_v29 = vadd.f32 %v975_v45, %v804_v12  ;;  %v980_v46 = vpop.permute.xlu1 %979 }
 0x143   :  { %v383_v0 = vpop.f32.mrb[22].mxu0  ;;  %v463_v10 = vpop.f32.mrb[22].mxu1 }
 0x144   :  { %v789_v26 = vmul.f32 %v1993_v14, %v383_v0  ;;  %v805_v2 = vmul.f32 %v2019_v30, %v463_v10  ;;  %v385_v39 = vpop.f32.mrb[23].mxu0  ;;  %v465_v34 = vpop.f32.mrb[23].mxu1  ;;  %v1044_v43 = vmul.f32 %v2155_v63, %v2155_v63  ;;  %v1060_v35 = vmul.f32 %v2159_v29, %v2159_v29 }
 0x146   :  { %v2166_v24 = vadd.f32 %v2043_v47, %v789_v26  ;;  %1116 = vadd.xlane.f32.xlu0 %v1059_v13  ;;  %1086 = vadd.xlane.f32.xlu1 %v1044_v43  ;;  %v2168_v4 = vadd.f32 %v980_v46, %v805_v2  ;;  %v985_v47 = vpop.permute.xlu0 %984 }
 0x147   :  { %v388_v11 = vpop.f32.mrb[24].mxu0  ;;  %v468_v5 = vpop.f32.mrb[24].mxu1 }
 0x148   :  { %v790_v22 = vmul.f32 %v1995_v15, %v388_v11  ;;  %v806_v14 = vmul.f32 %v2021_v31, %v468_v5  ;;  %v390_v30 = vpop.f32.mrb[25].mxu0  ;;  %v470_v41 = vpop.f32.mrb[25].mxu1  ;;  %v1045_v54 = vmul.f32 %v2166_v24, %v2166_v24  ;;  %v1061_v15 = vmul.f32 %v2168_v4, %v2168_v4 }
 0x14a   :  { %v2177_v44 = vadd.f32 %v2045_v48, %v790_v22  ;;  %1118 = vadd.xlane.f32.xlu1 %v1060_v35  ;;  %1088 = vadd.xlane.f32.xlu0 %v1045_v54  ;;  %v2181_v31 = vadd.f32 %v985_v47, %v806_v14  ;;  %v990_v48 = vpop.permute.xlu1 %989 }
 0x14b   :  { %v393_v8 = vpop.f32.mrb[26].mxu0  ;;  %v473_v59 = vpop.f32.mrb[26].mxu1 }
 0x14c   :  { %v791_v61 = vmul.f32 %v1997_v16, %v393_v8  ;;  %v807_v12 = vmul.f32 %v2023_v32, %v473_v59  ;;  %v395_v28 = vpop.f32.mrb[27].mxu0  ;;  %v475_v6 = vpop.f32.mrb[27].mxu1  ;;  %v1046_v42 = vmul.f32 %v2177_v44, %v2177_v44  ;;  %v1062_v2 = vmul.f32 %v2181_v31, %v2181_v31 }
 0x14e   :  { %v2188_v21 = vadd.f32 %v2047_v49, %v791_v61  ;;  %1120 = vadd.xlane.f32.xlu0 %v1061_v15  ;;  %1090 = vadd.xlane.f32.xlu1 %v1046_v42  ;;  %v2190_v45 = vadd.f32 %v990_v48, %v807_v12  ;;  %v995_v49 = vpop.permute.xlu0 %994  ;;  %v1000_v41 = vpop.permute.xlu1 %999 }
 0x14f   :  { %v398_v0 = vpop.f32.mrb[28].mxu0  ;;  %v478_v10 = vpop.f32.mrb[28].mxu1 }
 0x150   :  { %v792_v13 = vmul.f32 %v1999_v17, %v398_v0  ;;  %v808_v16 = vmul.f32 %v2025_v33, %v478_v10  ;;  %v400_v32 = vpop.f32.mrb[29].mxu0  ;;  %v480_v26 = vpop.f32.mrb[29].mxu1  ;;  %v1047_v39 = vmul.f32 %v2188_v21, %v2188_v21  ;;  %v1063_v17 = vmul.f32 %v2190_v45, %v2190_v45 }
 0x152   :  { %v2199_v34 = vadd.f32 %v2049_v50, %v792_v13  ;;  %1122 = vadd.xlane.f32.xlu1 %v1062_v2  ;;  %1092 = vadd.xlane.f32.xlu0 %v1047_v39  ;;  %v2203_v33 = vadd.f32 %v995_v49, %v808_v16 }
 0x153   :  { %v403_v43 = vpop.f32.mrb[30].mxu0  ;;  %v483_v46 = vpop.f32.mrb[30].mxu1 }
 0x154   :  { %v793_v11 = vmul.f32 %v2001_v18, %v403_v43  ;;  %v809_v5 = vmul.f32 %v2027_v36, %v483_v46  ;;  %v405_v22 = vpop.f32.mrb[31].mxu0  ;;  %v1048_v14 = vmul.f32 %v2199_v34, %v2199_v34  ;;  %v485_v30 = vpop.f32.mrb[31].mxu1  ;;  %v1064_v54 = vmul.f32 %v2203_v33, %v2203_v33 }
 0x156   :  { %v2210_v50 = vadd.f32 %v2051_v51, %v793_v11  ;;  %1124 = vadd.xlane.f32.xlu0 %v1063_v17  ;;  %1094 = vadd.xlane.f32.xlu1 %v1048_v14  ;;  %v2212_v35 = vadd.f32 %v1000_v41, %v809_v5 }
 0x158   :  { %v1049_v18 = vmul.f32 %v2210_v50, %v2210_v50  ;;  %v1065_v36 = vmul.f32 %v2212_v35, %v2212_v35 }
 0x15a   :  { %1126 = vadd.xlane.f32.xlu1 %v1064_v54  ;;  %1096 = vadd.xlane.f32.xlu0 %v1049_v18 }
 0x15e   :  { %1128 = vadd.xlane.f32.xlu0 %v1065_v36 }
 0x1ab   :  { %v1099_v47 = vpop.xlane.xlu1 %1098  ;;  %v1067_v51 = vpop.xlane.xlu0 %1066 }
 0x1ac   :  { %v1146_v8 = vmax.f32 %v1099_v47, 1e-24  ;;  %v1130_v59 = vmax.f32 %v1067_v51, 1e-24 }
 0x1ae   :  { %1393 = vrsqrt.f32 %v1146_v8 }
 0x1af   :  { %1395 = vrsqrt.f32 %v1130_v59  ;;  %v1101_v15 = vpop.xlane.xlu0 %1100  ;;  %v1069_v61 = vpop.xlane.xlu1 %1068 }
 0x1b0   :  { %v1147_v12 = vmax.f32 %v1101_v15, 1e-24  ;;  %v1131_v28 = vmax.f32 %v1069_v61, 1e-24 }
 0x1b2   :  { %1397 = vrsqrt.f32 %v1147_v12 }
 0x1b3   :  { %1399 = vrsqrt.f32 %v1131_v28  ;;  %v1103_v6 = vpop.xlane.xlu1 %1102  ;;  %v1071_v42 = vpop.xlane.xlu0 %1070 }
 0x1b4   :  { %v1148_v48 = vmax.f32 %v1103_v6, 1e-24  ;;  %v1132_v0 = vmax.f32 %v1071_v42, 1e-24 }
 0x1b6   :  { %1401 = vrsqrt.f32 %v1148_v48 }
 0x1b7   :  { %1403 = vrsqrt.f32 %v1132_v0  ;;  %v1073_v10 = vpop.xlane.xlu0 %1072 }
 0x1b8   :  { %v1394_v13 = vpop.eup %1393  ;;  %v1133_v16 = vmax.f32 %v1073_v10, 1e-24 }
 0x1b9   :  { %v1396_v32 = vpop.eup %1395  ;;  %v1210_v26 = vmul.f32 %v1394_v13, %v2055_v58 }
 0x1ba   :  { %v1194_v2 = vmul.f32 %v1396_v32, %v2053_v57  ;;  %1405 = vrsqrt.f32 %v1133_v16 }
 0x1bb   :  { %v1242_v39 = vmax.f32 %v1210_v26, 0.0  ;;  %v1105_v49 = vpop.xlane.xlu0 %1104  ;;  %v1075_v43 = vpop.xlane.xlu1 %1074 }
 0x1bc   :  { %v1398_v46 = vpop.eup %1397  ;;  %v1226_v17 = vmax.f32 %v1194_v2, 0.0  ;;  %v1149_v11 = vmax.f32 %v1105_v49, 1e-24  ;;  %v1134_v5 = vmax.f32 %v1075_v43, 1e-24 }
 0x1bd   :  { %v1400_v22 = vpop.eup %1399  ;;  %1274 = vst [vmem:[#allocation3 + $0x80] sm:$0xff] %v1242_v39  ;;  %v1211_v14 = vmul.f32 %v1398_v46, %v2063_v53 }
 0x1be   :  { %1258 = vst [vmem:[#allocation3] sm:$0xff] %v1226_v17  ;;  %v1195_v30 = vmul.f32 %v1400_v22, %v2061_v52  ;;  %1407 = vrsqrt.f32 %v1149_v11 }
 0x1bf   :  { %v1243_v41 = vmax.f32 %v1211_v14, 0.0  ;;  %1409 = vrsqrt.f32 %v1134_v5  ;;  %v1107_v58 = vpop.xlane.xlu1 %1106  ;;  %v1077_v57 = vpop.xlane.xlu0 %1076 }
 0x1c0   :  { %v1402_v54 = vpop.eup %1401  ;;  %v1227_v18 = vmax.f32 %v1195_v30, 0.0  ;;  %v1150_v36 = vmax.f32 %v1107_v58, 1e-24  ;;  %v1135_v47 = vmax.f32 %v1077_v57, 1e-24 }
 0x1c1   :  { %v1404_v51 = vpop.eup %1403  ;;  %1275 = vst [vmem:[#allocation3 + $0x88] sm:$0xff] %v1243_v41  ;;  %v1212_v8 = vmul.f32 %v1402_v54, %v2072_v60 }
 0x1c2   :  { %1259 = vst [vmem:[#allocation3 + $0x8] sm:$0xff] %v1227_v18  ;;  %v1196_v59 = vmul.f32 %v1404_v51, %v2070_v38  ;;  %1411 = vrsqrt.f32 %v1150_v36 }
 0x1c3   :  { %v1244_v53 = vmax.f32 %v1212_v8, 0.0  ;;  %1413 = vrsqrt.f32 %v1135_v47  ;;  %v1109_v52 = vpop.xlane.xlu0 %1108  ;;  %v1079_v15 = vpop.xlane.xlu1 %1078 }
 0x1c4   :  { %v1406_v61 = vpop.eup %1405  ;;  %v1228_v12 = vmax.f32 %v1196_v59, 0.0  ;;  %v1151_v28 = vmax.f32 %v1109_v52, 1e-24  ;;  %v1136_v6 = vmax.f32 %v1079_v15, 1e-24 }
 0x1c5   :  { %1276 = vst [vmem:[#allocation3 + $0x90] sm:$0xff] %v1244_v53  ;;  %v1197_v42 = vmul.f32 %v1406_v61, %v2080_v19 }
 0x1c6   :  { %1260 = vst [vmem:[#allocation3 + $0x10] sm:$0xff] %v1228_v12  ;;  %1415 = vrsqrt.f32 %v1151_v28 }
 0x1c7   :  { %v1229_v48 = vmax.f32 %v1197_v42, 0.0  ;;  %1417 = vrsqrt.f32 %v1136_v6  ;;  %v1111_v60 = vpop.xlane.xlu1 %1110  ;;  %v1081_v0 = vpop.xlane.xlu0 %1080 }
 0x1c8   :  { %v1408_v10 = vpop.eup %1407  ;;  %v1152_v38 = vmax.f32 %v1111_v60, 1e-24  ;;  %v1137_v13 = vmax.f32 %v1081_v0, 1e-24 }
 0x1c9   :  { %v1410_v16 = vpop.eup %1409  ;;  %1261 = vst [vmem:[#allocation3 + $0x18] sm:$0xff] %v1229_v48  ;;  %v1213_v32 = vmul.f32 %v1408_v10, %v2082_v37 }
 0x1ca   :  { %v1198_v26 = vmul.f32 %v1410_v16, %v2089_v56  ;;  %1419 = vrsqrt.f32 %v1152_v38 }
 0x1cb   :  { %v1245_v2 = vmax.f32 %v1213_v32, 0.0  ;;  %1421 = vrsqrt.f32 %v1137_v13  ;;  %v1113_v39 = vpop.xlane.xlu0 %1112  ;;  %v1083_v19 = vpop.xlane.xlu1 %1082 }
 0x1cc   :  { %v1412_v49 = vpop.eup %1411  ;;  %v1230_v43 = vmax.f32 %v1198_v26, 0.0  ;;  %v1153_v46 = vmax.f32 %v1113_v39, 1e-24  ;;  %v1138_v17 = vmax.f32 %v1083_v19, 1e-24 }
 0x1cd   :  { %v1414_v11 = vpop.eup %1413  ;;  %1277 = vst [vmem:[#allocation3 + $0x98] sm:$0xff] %v1245_v2  ;;  %v1214_v5 = vmul.f32 %v1412_v49, %v2093_v62 }
 0x1ce   :  { %1262 = vst [vmem:[#allocation3 + $0x20] sm:$0xff] %v1230_v43  ;;  %v1199_v22 = vmul.f32 %v1414_v11, %v2100_v40  ;;  %1423 = vrsqrt.f32 %v1153_v46 }
 0x1cf   :  { %v1246_v37 = vmax.f32 %v1214_v5, 0.0  ;;  %1425 = vrsqrt.f32 %v1138_v17  ;;  %v1115_v56 = vpop.xlane.xlu1 %1114  ;;  %v1085_v14 = vpop.xlane.xlu0 %1084 }
 0x1d0   :  { %v1416_v30 = vpop.eup %1415  ;;  %v1231_v41 = vmax.f32 %v1199_v22, 0.0  ;;  %v1154_v58 = vmax.f32 %v1115_v56, 1e-24  ;;  %v1139_v57 = vmax.f32 %v1085_v14, 1e-24 }
 0x1d1   :  { %v1418_v54 = vpop.eup %1417  ;;  %1278 = vst [vmem:[#allocation3 + $0xa0] sm:$0xff] %v1246_v37  ;;  %v1215_v18 = vmul.f32 %v1416_v30, %v2102_v1 }
 0x1d2   :  { %1263 = vst [vmem:[#allocation3 + $0x28] sm:$0xff] %v1231_v41  ;;  %v1200_v36 = vmul.f32 %v1418_v54, %v2111_v20  ;;  %1427 = vrsqrt.f32 %v1154_v58 }
 0x1d3   :  { %v1247_v62 = vmax.f32 %v1215_v18, 0.0  ;;  %1429 = vrsqrt.f32 %v1139_v57  ;;  %v1117_v40 = vpop.xlane.xlu0 %1116  ;;  %v1087_v47 = vpop.xlane.xlu1 %1086 }
 0x1d4   :  { %v1420_v51 = vpop.eup %1419  ;;  %v1232_v8 = vmax.f32 %v1200_v36, 0.0  ;;  %v1155_v59 = vmax.f32 %v1117_v40, 1e-24  ;;  %v1140_v53 = vmax.f32 %v1087_v47, 1e-24 }
 0x1d5   :  { %v1422_v52 = vpop.eup %1421  ;;  %1279 = vst [vmem:[#allocation3 + $0xa8] sm:$0xff] %v1247_v62  ;;  %v1216_v15 = vmul.f32 %v1420_v51, %v2115_v25 }
 0x1d6   :  { %1264 = vst [vmem:[#allocation3 + $0x30] sm:$0xff] %v1232_v8  ;;  %v1201_v61 = vmul.f32 %v1422_v52, %v2122_v23  ;;  %1431 = vrsqrt.f32 %v1155_v59 }
 0x1d7   :  { %v1248_v1 = vmax.f32 %v1216_v15, 0.0  ;;  %1433 = vrsqrt.f32 %v1140_v53  ;;  %v1119_v20 = vpop.xlane.xlu1 %1118  ;;  %v1089_v12 = vpop.xlane.xlu0 %1088 }
 0x1d8   :  { %v1424_v28 = vpop.eup %1423  ;;  %v1233_v6 = vmax.f32 %v1201_v61, 0.0  ;;  %v1156_v42 = vmax.f32 %v1119_v20, 1e-24  ;;  %v1141_v48 = vmax.f32 %v1089_v12, 1e-24 }
 0x1d9   :  { %v1426_v60 = vpop.eup %1425  ;;  %1280 = vst [vmem:[#allocation3 + $0xb0] sm:$0xff] %v1248_v1  ;;  %v1217_v0 = vmul.f32 %v1424_v28, %v2124_v3 }
 0x1da   :  { %1265 = vst [vmem:[#allocation3 + $0x38] sm:$0xff] %v1233_v6  ;;  %v1202_v10 = vmul.f32 %v1426_v60, %v2133_v7  ;;  %1435 = vrsqrt.f32 %v1156_v42 }
 0x1db   :  { %v1249_v25 = vmax.f32 %v1217_v0, 0.0  ;;  %1437 = vrsqrt.f32 %v1141_v48  ;;  %v1121_v23 = vpop.xlane.xlu0 %1120  ;;  %v1091_v38 = vpop.xlane.xlu1 %1090 }
 0x1dc   :  { %v1428_v13 = vpop.eup %1427  ;;  %v1234_v16 = vmax.f32 %v1202_v10, 0.0  ;;  %v1157_v32 = vmax.f32 %v1121_v23, 1e-24  ;;  %v1142_v26 = vmax.f32 %v1091_v38, 1e-24 }
 0x1dd   :  { %v1430_v2 = vpop.eup %1429  ;;  %1281 = vst [vmem:[#allocation3 + $0xb8] sm:$0xff] %v1249_v25  ;;  %v1218_v39 = vmul.f32 %v1428_v13, %v2137_v27 }
 0x1de   :  { %1266 = vst [vmem:[#allocation3 + $0x40] sm:$0xff] %v1234_v16  ;;  %v1203_v19 = vmul.f32 %v1430_v2, %v2144_v9  ;;  %1439 = vrsqrt.f32 %v1157_v32 }
 0x1df   :  { %v1250_v3 = vmax.f32 %v1218_v39, 0.0  ;;  %1441 = vrsqrt.f32 %v1142_v26  ;;  %v1123_v7 = vpop.xlane.xlu1 %1122  ;;  %v1093_v49 = vpop.xlane.xlu0 %1092 }
 0x1e0   :  { %v1432_v43 = vpop.eup %1431  ;;  %v1235_v46 = vmax.f32 %v1203_v19, 0.0  ;;  %v1158_v17 = vmax.f32 %v1123_v7, 1e-24  ;;  %v1143_v11 = vmax.f32 %v1093_v49, 1e-24 }
 0x1e1   :  { %v1434_v5 = vpop.eup %1433  ;;  %1282 = vst [vmem:[#allocation3 + $0xc0] sm:$0xff] %v1250_v3  ;;  %v1219_v22 = vmul.f32 %v1432_v43, %v2146_v55 }
 0x1e2   :  { %1267 = vst [vmem:[#allocation3 + $0x48] sm:$0xff] %v1235_v46  ;;  %v1204_v37 = vmul.f32 %v1434_v5, %v2155_v63  ;;  %1443 = vrsqrt.f32 %v1158_v17 }
 0x1e3   :  { %v1251_v27 = vmax.f32 %v1219_v22, 0.0  ;;  %1445 = vrsqrt.f32 %v1143_v11  ;;  %v1125_v9 = vpop.xlane.xlu0 %1124  ;;  %v1095_v56 = vpop.xlane.xlu1 %1094 }
 0x1e4   :  { %v1436_v14 = vpop.eup %1435  ;;  %v1236_v30 = vmax.f32 %v1204_v37, 0.0  ;;  %v1159_v41 = vmax.f32 %v1125_v9, 1e-24  ;;  %v1144_v58 = vmax.f32 %v1095_v56, 1e-24 }
 0x1e5   :  { %v1438_v57 = vpop.eup %1437  ;;  %1283 = vst [vmem:[#allocation3 + $0xc8] sm:$0xff] %v1251_v27  ;;  %v1220_v54 = vmul.f32 %v1436_v14, %v2159_v29 }
 0x1e6   :  { %1268 = vst [vmem:[#allocation3 + $0x50] sm:$0xff] %v1236_v30  ;;  %v1205_v18 = vmul.f32 %v1438_v57, %v2166_v24  ;;  %1447 = vrsqrt.f32 %v1159_v41 }
 0x1e7   :  { %v1252_v55 = vmax.f32 %v1220_v54, 0.0  ;;  %1449 = vrsqrt.f32 %v1144_v58  ;;  %v1127_v63 = vpop.xlane.xlu1 %1126  ;;  %v1097_v36 = vpop.xlane.xlu0 %1096 }
 0x1e8   :  { %v1440_v62 = vpop.eup %1439  ;;  %v1237_v40 = vmax.f32 %v1205_v18, 0.0  ;;  %v1160_v47 = vmax.f32 %v1127_v63, 1e-24  ;;  %v1145_v51 = vmax.f32 %v1097_v36, 1e-24 }
 0x1e9   :  { %v1442_v8 = vpop.eup %1441  ;;  %1284 = vst [vmem:[#allocation3 + $0xd0] sm:$0xff] %v1252_v55  ;;  %v1221_v59 = vmul.f32 %v1440_v62, %v2168_v4 }
 0x1ea   :  { %1269 = vst [vmem:[#allocation3 + $0x58] sm:$0xff] %v1237_v40  ;;  %v1206_v53 = vmul.f32 %v1442_v8, %v2177_v44  ;;  %1451 = vrsqrt.f32 %v1160_v47 }
 0x1eb   :  { %v1253_v29 = vmax.f32 %v1221_v59, 0.0  ;;  %1453 = vrsqrt.f32 %v1145_v51  ;;  %v1129_v24 = vpop.xlane.xlu0 %1128 }
 0x1ec   :  { %v1444_v52 = vpop.eup %1443  ;;  %v1238_v15 = vmax.f32 %v1206_v53, 0.0  ;;  %v1161_v61 = vmax.f32 %v1129_v24, 1e-24 }
 0x1ed   :  { %v1446_v1 = vpop.eup %1445  ;;  %1285 = vst [vmem:[#allocation3 + $0xd8] sm:$0xff] %v1253_v29  ;;  %v1222_v20 = vmul.f32 %v1444_v52, %v2181_v31 }
 0x1ee   :  { %1270 = vst [vmem:[#allocation3 + $0x60] sm:$0xff] %v1238_v15  ;;  %v1207_v12 = vmul.f32 %v1446_v1, %v2188_v21  ;;  %1455 = vrsqrt.f32 %v1161_v61 }
 0x1ef   :  { %v1254_v28 = vmax.f32 %v1222_v20, 0.0 }
 0x1f0   :  { %v1448_v4 = vpop.eup %1447  ;;  %v1239_v6 = vmax.f32 %v1207_v12, 0.0 }
 0x1f1   :  { %v1450_v42 = vpop.eup %1449  ;;  %1286 = vst [vmem:[#allocation3 + $0xe0] sm:$0xff] %v1254_v28  ;;  %v1223_v44 = vmul.f32 %v1448_v4, %v2190_v45 }
 0x1f2   :  { %1271 = vst [vmem:[#allocation3 + $0x68] sm:$0xff] %v1239_v6  ;;  %v1208_v48 = vmul.f32 %v1450_v42, %v2199_v34 }
 0x1f3   :  { %v1255_v60 = vmax.f32 %v1223_v44, 0.0 }
 0x1f4   :  { %v1452_v0 = vpop.eup %1451  ;;  %v1240_v10 = vmax.f32 %v1208_v48, 0.0 }
 0x1f5   :  { %v1454_v25 = vpop.eup %1453  ;;  %1287 = vst [vmem:[#allocation3 + $0xe8] sm:$0xff] %v1255_v60  ;;  %v1224_v31 = vmul.f32 %v1452_v0, %v2203_v33 }
 0x1f6   :  { %1272 = vst [vmem:[#allocation3 + $0x70] sm:$0xff] %v1240_v10  ;;  %v1209_v21 = vmul.f32 %v1454_v25, %v2210_v50 }
 0x1f7   :  { %v1256_v23 = vmax.f32 %v1224_v31, 0.0 }
 0x1f8   :  { %v1456_v38 = vpop.eup %1455  ;;  %v1241_v13 = vmax.f32 %v1209_v21, 0.0 }
 0x1f9   :  { %1288 = vst [vmem:[#allocation3 + $0xf0] sm:$0xff] %v1256_v23  ;;  %v1225_v45 = vmul.f32 %v1456_v38, %v2212_v35 }
 0x1fa   :  { %1273 = vst [vmem:[#allocation3 + $0x78] sm:$0xff] %v1241_v13 }
 0x1fb   :  { %v1257_v34 = vmax.f32 %v1225_v45, 0.0 }
 0x1fd   :  { %1289 = vst [vmem:[#allocation3 + $0xf8] sm:$0xff] %v1257_v34 }
 0x1fe   :  { %1468 = shalt.err (!%p1465_p4)
}
 0x1ff   :  { %s1469_s26 = scalar_lea.hbm %s2268_s4, 4096 }
 0x200   :  { %p1470_p5 = scmp.ne.s32.totalorder %s2268_s4, %s1469_s26  ;;  %p1473_p6 = scmp.lt.u32.totalorder %s1469_s26, %s2268_s4 }
 0x202   :  { %p1475_p7 = pnand %p1473_p6, %p1470_p5 }
 0x204   :  { %1478 = shalt.err (!%p1475_p7)
}
 0x205   :  { %s1484_s5 = smov 128   ;;  %s1485_s6 = smov 8  }
 0x206   :  { %1301 = dma.vmem_to_hbm [thread:$0]  %s1296_s22, 4096, %s2268_s4, [#allocation4], %s1484_s5, %s1484_s5, %s1485_s6  }
 0x207   :  { %1479 = dma.done.wait [#allocation4], 4096  }
 0x208   :  { %1480 = vsyncadd [#allocation4], 4294963200 }
 0x209   :  { %1305 = vsyncpa [#allocation4], 1 }

</bundles_post_ra>
